<compile_context>
chip_gen: v5e
topology: v5e:2x2
jax: 0.10.0
libtpu: 0.0.40
codegen_flags: <defaults>
</compile_context>

<pallas_src>
import functools

import jax
import jax.numpy as jnp
from jax.experimental import pallas as pl
from jax.experimental.pallas import tpu as pltpu


_VMEM_BUDGET = 40 << 20   # conservative tile budget (fits v7x's 64 MiB physical VMEM)
_VMEM_LIMIT = 48 << 20    # scoped VMEM limit handed to Mosaic (safe on v5e/v6e/v7x)


def _round_up(x: int, m: int) -> int:
    return (x + m - 1) // m * m


def _decoder_kernel(x_ref, w_ref, b_ref, o_ref):
    # Single K step (tk == Kp): no accumulator scratch, no pl.when epilogue.
    o_ref[...] = (
        jnp.dot(x_ref[...], w_ref[...], preferred_element_type=jnp.float32)
        + b_ref[...]
    ).astype(o_ref.dtype)


def _tile_vmem_bytes(tm, tn, kp, in_itemsize, out_itemsize):
    # double-buffered x / weight / bias input tiles + double-buffered out tile
    return 2 * (tm * kp * in_itemsize
                + kp * tn * in_itemsize
                + tn * 4
                + tm * tn * out_itemsize)


def _choose_tn(N, Kp, in_itemsize):
    tn = min(512, _round_up(N, 128))
    # keep the double-buffered weight tile alone under ~half the budget
    while tn > 128 and 2 * Kp * tn * in_itemsize > _VMEM_BUDGET // 2:
        tn //= 2
    return tn


def _choose_tm(M, tn, Kp, in_itemsize, out_itemsize):
    tm = min(512, _round_up(M, 16))
    # grow tm while the budget allows: weight HBM traffic = (Mp/tm)*Kp*Np*2B,
    # so each doubling of tm halves the dominant stream.
    while (tm * 2 <= min(1024, _round_up(M, 16))
           and _tile_vmem_bytes(tm * 2, tn, Kp, in_itemsize, out_itemsize)
           <= _VMEM_BUDGET):
        tm *= 2
    # shrink if over budget (floor at 16 rows for bf16 sublane packing)
    while (tm > 16
           and _tile_vmem_bytes(tm, tn, Kp, in_itemsize, out_itemsize)
           > _VMEM_BUDGET):
        tm = max(16, _round_up(tm // 2, 8))
    return tm


@functools.partial(jax.jit, static_argnames=("tm", "tn", "n_out", "out_dtype"))
def sm_decoder_forward(x, w_t, b2d, *, tm, tn, n_out, out_dtype=jnp.float32):
    """x: (M, K); w_t: (Kp, Np) pre-transposed + pre-padded; b2d: (1, Np) f32."""
    M, K = x.shape
    Kp, Np = w_t.shape
    assert Kp >= K and Kp % 128 == 0
    assert Np % tn == 0

    Mp = _round_up(M, tm)
    if (Mp, Kp) != (M, K):
        # Only the (small) activation is padded per call; the vocab-sized
        # weight was padded once at init.
        x = jnp.pad(x, ((0, Mp - M), (0, Kp - K)))

    grid = (Mp // tm, Np // tn)

    cost = pl.CostEstimate(
        flops=2 * Mp * Kp * Np,
        transcendentals=0,
        bytes_accessed=(
            Mp * Kp * x.dtype.itemsize                      # x: once per row-tile
            + (Mp // tm) * Kp * Np * w_t.dtype.itemsize     # weight re-streamed per row-tile
            + Np * 4
            + Mp * Np * jnp.dtype(out_dtype).itemsize
        ),
    )

    out = pl.pallas_call(
        _decoder_kernel,
        out_shape=jax.ShapeDtypeStruct((Mp, Np), out_dtype),
        grid_spec=pltpu.PrefetchScalarGridSpec(
            num_scalar_prefetch=0,
            grid=grid,
            in_specs=[
                # x block index is constant in j -> DMA'd once per row tile.
                pl.BlockSpec((tm, Kp), lambda i, j: (i, 0)),
                pl.BlockSpec((Kp, tn), lambda i, j: (0, j)),   # weight tile
                pl.BlockSpec((1, tn), lambda i, j: (0, j)),    # bias tile
            ],
            out_specs=pl.BlockSpec((tm, tn), lambda i, j: (i, j)),
        ),
        compiler_params=pltpu.CompilerParams(
            dimension_semantics=("parallel", "parallel"),
            vmem_limit_bytes=_VMEM_LIMIT,
        ),
        cost_estimate=cost,
    )(x, w_t, b2d)

    if Mp != M or Np != n_out:
        out = out[:M, :n_out]
    return out


class SMDecoderPallas:
    """JAX/Pallas port of SMDecoder: forward(input) = Linear(nhid -> ntoken)."""

    def __init__(self, nhid, ntoken, key, compute_dtype=jnp.bfloat16):
        self.nhid = nhid
        self.ntoken = ntoken
        self.compute_dtype = compute_dtype
        initrange = 0.1
        # Matches SMDecoder.init_weights(): weight ~ U(-0.1, 0.1), bias = 0.
        self.weight = jax.random.uniform(
            key, (ntoken, nhid), dtype=jnp.float32,
            minval=-initrange, maxval=initrange)
        self.bias = jnp.zeros((ntoken,), dtype=jnp.float32)

        in_itemsize = jnp.dtype(compute_dtype).itemsize
        self.Kp = _round_up(nhid, 128)
        self.tn = _choose_tn(ntoken, self.Kp, in_itemsize)
        self.Np = _round_up(ntoken, self.tn)

        # Pre-transpose + cast + pad ONCE (hoisted out of the forward hot path).
        w_t = self.weight.T.astype(compute_dtype)                  # (nhid, ntoken)
        self.w_t = jnp.pad(w_t, ((0, self.Kp - nhid), (0, self.Np - ntoken)))
        self.b2d = jnp.pad(self.bias.reshape(1, ntoken).astype(jnp.float32),
                           ((0, 0), (0, self.Np - ntoken)))

    def __call__(self, x, out_dtype=jnp.float32):
        # x: (..., nhid) -> flatten leading dims, run kernel, restore shape.
        lead = x.shape[:-1]
        x2d = x.reshape(-1, self.nhid).astype(self.compute_dtype)
        tm = _choose_tm(x2d.shape[0], self.tn, self.Kp,
                        jnp.dtype(self.compute_dtype).itemsize,
                        jnp.dtype(out_dtype).itemsize)
        out = sm_decoder_forward(x2d, self.w_t, self.b2d,
                                 tm=tm, tn=self.tn, n_out=self.ntoken,
                                 out_dtype=out_dtype)
        return out.reshape(*lead, self.ntoken)

    # TODO(synk): forward_with_loss (CrossEntropyLoss) is training-only glue;
    # fusing the log-softmax reduction into the GEMM epilogue is a further
    # bandwidth win but is not implemented here.


if __name__ == "__main__":
    key = jax.random.PRNGKey(0)
    k_w, k_x = jax.random.split(key)

    batch, seq, nhid, ntoken = 2, 8, 32, 64
    decoder = SMDecoderPallas(nhid, ntoken, k_w)

    rnn_output = jax.random.normal(k_x, (batch, seq, nhid), dtype=jnp.float32)

    out = decoder(rnn_output)
    out = jax.block_until_ready(out)
    assert out.shape == (batch, seq, ntoken)

    # Reference with identical bf16-input / f32-accumulate semantics.
    x_bf = rnn_output.reshape(-1, nhid).astype(jnp.bfloat16)
    w_t_bf = decoder.weight.T.astype(jnp.bfloat16)
    ref = (jnp.dot(x_bf, w_t_bf, preferred_element_type=jnp.float32)
           + decoder.bias).reshape(batch, seq, ntoken)
    assert jnp.allclose(out, ref, atol=1e-3, rtol=1e-3)

    # Coarse check against the exact f32 Linear (bf16 rounding only).
    ref_f32 = rnn_output @ decoder.weight.T + decoder.bias
    assert jnp.allclose(out, ref_f32, atol=5e-2, rtol=5e-2)

    print("KERNEL_OK")
</pallas_src>

<mosaic_0001>
module attributes {stable_mosaic.version = 11 : i64} {
  func.func @_decoder_kernel(%arg0: i32, %arg1: i32, %arg2: memref<16x128xbf16, #tpu.memory_space<vmem>>, %arg3: memref<128x128xbf16, #tpu.memory_space<vmem>>, %arg4: memref<1x128xf32, #tpu.memory_space<vmem>>, %arg5: memref<16x128xf32, #tpu.memory_space<vmem>>) attributes {dimension_semantics = [#tpu.dimension_semantics<parallel>, #tpu.dimension_semantics<parallel>], iteration_bounds = array<i64: 1, 1>, scalar_prefetch = 0 : i64, scratch_operands = 0 : i64, tpu.core_type = #tpu.core_type<tc>, window_params = [{transform_indices = @transform_0, window_bounds = array<i64: 16, 128>}, {transform_indices = @transform_1, window_bounds = array<i64: 128, 128>}, {transform_indices = @transform_2, window_bounds = array<i64: 1, 128>}, {transform_indices = @transform_3, window_bounds = array<i64: 16, 128>}]} {
    %c0 = arith.constant 0 : index
    %c0_0 = arith.constant 0 : index
    %0 = vector.load %arg2[%c0, %c0_0] : memref<16x128xbf16, #tpu.memory_space<vmem>>, vector<16x128xbf16>
    %c0_1 = arith.constant 0 : index
    %c0_2 = arith.constant 0 : index
    %1 = vector.load %arg3[%c0_1, %c0_2] : memref<128x128xbf16, #tpu.memory_space<vmem>>, vector<128x128xbf16>
    %cst = arith.constant dense<0.000000e+00> : vector<16x128xf32>
    %2 = tpu.matmul %0, %1, %cst {dimension_numbers = #tpu.dot_dimension_numbers<[1], [0], [0], [1], [0, 0, 1, 1], [], []>} : vector<16x128xbf16>, vector<128x128xbf16>, vector<16x128xf32> -> vector<16x128xf32>
    %c0_3 = arith.constant 0 : index
    %c0_4 = arith.constant 0 : index
    %3 = vector.load %arg4[%c0_3, %c0_4] : memref<1x128xf32, #tpu.memory_space<vmem>>, vector<1x128xf32>
    %4 = vector.broadcast %3 : vector<1x128xf32> to vector<16x128xf32>
    %5 = arith.addf %2, %4 : vector<16x128xf32>
    %c0_5 = arith.constant 0 : index
    %c0_6 = arith.constant 0 : index
    %6 = vector.load %arg5[%c0_5, %c0_6] : memref<16x128xf32, #tpu.memory_space<vmem>>, vector<16x128xf32>
    tpu.vector_store %arg5[%c0_5, %c0_6], %5 {strides = array<i32>} : memref<16x128xf32, #tpu.memory_space<vmem>>, vector<16x128xf32>,
    return
  }
  func.func @transform_0(%arg0: i32, %arg1: i32) -> (i32, i32) {
    %c0_i32 = arith.constant 0 : i32
    %c0_i32_0 = arith.constant 0 : i32
    return %arg0, %c0_i32 : i32, i32
  }
  func.func @transform_1(%arg0: i32, %arg1: i32) -> (i32, i32) {
    %c0_i32 = arith.constant 0 : i32
    %c0_i32_0 = arith.constant 0 : i32
    return %c0_i32, %arg1 : i32, i32
  }
  func.func @transform_2(%arg0: i32, %arg1: i32) -> (i32, i32) {
    %c0_i32 = arith.constant 0 : i32
    %c0_i32_0 = arith.constant 0 : i32
    return %c0_i32, %arg1 : i32, i32
  }
  func.func @transform_3(%arg0: i32, %arg1: i32) -> (i32, i32) {
    %c0_i32 = arith.constant 0 : i32
    return %arg0, %arg1 : i32, i32
  }
}

</mosaic_0001>

<bundles_post_ra>
// kernel: sm_decoder_forward.1
= control target key start
LH: loop header
LB: loop body
LE: loop exit
PB: predicated region body
PF: predicated region fallthrough
CT: control target
= control target key end

     0   :  { %8 = vsyncpa [#allocation3], 0  ;;  %s284_s0 = inlined_call_operand.vmem [shape: bf16[16,128], index: 0, kind: input, shape index: {}]   ;;  %s285_s1 = inlined_call_operand.hbm [shape: bf16[128,128], index: 1, kind: input, shape index: {}]   ;;  %s286_s2 = inlined_call_operand.vmem [shape: f32[1,128], index: 2, kind: input, shape index: {}]   ;;  %s287_s3 = inlined_call_operand.hbm [shape: f32[16,128], index: 3, kind: output, shape index: {}]  }
   0x1   :  { %9 = vsyncpa [#allocation4], 0  ;;  %s16_s14 = sshll.u32 %s285_s1, 4  ;;  %s246_s15 = smov [#allocation2]   ;;  %s17_s14 = int_to_ptr.hbm [resolvable:$true] %s16_s14 }
   0x2   :  { %s18_s16 = sshll.u32 %s246_s15, 4  ;;  %s247_s17 = smov 64   ;;  %s19_s16 = int_to_ptr.vmem [resolvable:$true] %s18_s16 }
   0x3   :  { %s248_s18 = smov 4  }
   0x4   :  { %24 = dma.hbm_to_vmem [thread:$0]  %s17_s14, 1024, %s19_s16, [#allocation3], %s247_s17, %s247_s17, %s248_s18  }
   0x5   :  { %242 = dma.done.wait [#allocation3], 1024  }
   0x6   :  { %243 = vsyncadd [#allocation3], 4294966272  ;;  %v186_v0 = vld [vmem:[#allocation2 + $0x38] sm:$0xff]  ;;  %v185_v1 = vld [vmem:[#allocation2 + $0x30] sm:$0xff]  ;;  %s249_s22 = smov [#allocation5]   ;;  %s129_s26 = sshll.u32 %s287_s3, 4  ;;  %s130_s26 = int_to_ptr.hbm [resolvable:$true] %s129_s26 }
   0x7   :  { %107 = vmatpush.bf16.msra.mxu0 %v186_v0  ;;  %v184_v2 = vld [vmem:[#allocation2 + $0x28] sm:$0xff]  ;;  %v183_v3 = vld [vmem:[#allocation2 + $0x20] sm:$0xff]  ;;  %v182_v4 = vld [vmem:[#allocation2 + $0x18] sm:$0xff]  ;;  %s127_s23 = sshll.u32 %s249_s22, 4  ;;  %s251_s27 = smov 8   ;;  %s128_s23 = int_to_ptr.vmem [resolvable:$true] %s127_s23 }
   0x8   :  { %v181_v5 = vld [vmem:[#allocation2 + $0x10] sm:$0xff]  ;;  %v180_v6 = vld [vmem:[#allocation2 + $0x8] sm:$0xff]  ;;  %v179_v7 = vld [vmem:[#allocation2] sm:$0xff] }
   0x9   :  { %v178_v8 = vld [vmem:[%s284_s0] sm:$0xff]  ;;  %s250_s0 = smov 128  }
   0xa   :  { %v193_v9 = vld [vmem:[%s286_s2] ss:$0 sm:$0xff] }
   0xb   :  { %108 = vmatpush.bf16.msra.mxu0 %v185_v1 }
   0xf   :  { %109 = vmatpush.bf16.msra.mxu0 %v184_v2 }
  0x13   :  { %110 = vmatpush.bf16.msra.mxu0 %v183_v3 }
  0x17   :  { %111 = vmatpush.bf16.msra.mxu0 %v182_v4 }
  0x1b   :  { %112 = vmatpush.bf16.msra.mxu0 %v181_v5 }
  0x1f   :  { %113 = vmatpush.bf16.msra.mxu0 %v180_v6 }
  0x23   :  { %114 = vmatpush.bf16.msra.mxu0 %v179_v7 }
  0x26   :  { %115 = vmatmul.bf16.vlgmr.msra.gmra.mxu0 %v178_v8 }
  0xa3   :  { %v116_v10 = vpop.f32.mrf.mxu0 }
  0xa4   :  { %v117_v11 = vadd.f32 %v193_v9, %v116_v10 }
  0xa6   :  { %121 = vst [vmem:[#allocation5] sm:$0xff] %v117_v11 }
  0xab   :  { %v118_v12 = vpop.f32.mrf.mxu0 }
  0xac   :  { %v119_v13 = vadd.f32 %v193_v9, %v118_v12 }
  0xae   :  { %122 = vst [vmem:[#allocation5 + $0x8] sm:$0xff] %v119_v13 }
  0xaf   :  { %135 = dma.vmem_to_hbm [thread:$0]  %s128_s23, 256, %s130_s26, [#allocation4], %s250_s0, %s250_s0, %s251_s27  }
  0xb0   :  { %244 = dma.done.wait [#allocation4], 256  }
  0xb1   :  { %245 = vsyncadd [#allocation4], 4294967040 }
  0xb2   :  { %140 = vsyncpa [#allocation3], 1 }
  0xb3   :  { %141 = vsyncpa [#allocation4], 1 }

</bundles_post_ra>
